<compile_context>
chip_gen: v6e
topology: v6e:2x2x1
jax: 0.10.0
libtpu: 0.0.40
codegen_flags: <defaults>
</compile_context>

<pallas_src>
import functools

import jax
import jax.numpy as jnp
from jax.experimental import pallas as pl
from jax.experimental.pallas import tpu as pltpu


def _cdiv(a, b):
    return (a + b - 1) // b


def _round_up(x, m):
    return ((x + m - 1) // m) * m


def _round_down_to(x, m):
    return max(m, (x // m) * m)


# ---------------------------------------------------------------------------
# Kernel: one (tm, tn) output tile; grid axis 2 runs over the K reduction.
# ---------------------------------------------------------------------------
def _matmul_kernel(*refs, has_bias: bool, use_acc_scratch: bool):
    if has_bias:
        x_ref, w_ref, b_ref, *rest = refs
    else:
        x_ref, w_ref, *rest = refs
        b_ref = None
    if use_acc_scratch:
        o_ref, acc_ref = rest          # narrow output dtype: f32 VMEM scratch
    else:
        (o_ref,) = rest                # f32 output: accumulate in place
        acc_ref = o_ref

    k = pl.program_id(2)

    @pl.when(k == 0)
    def _init():
        if has_bias:
            acc_ref[...] = jnp.broadcast_to(
                b_ref[...].astype(jnp.float32), acc_ref.shape)
        else:
            acc_ref[...] = jnp.zeros_like(acc_ref)

    acc_ref[...] += jnp.dot(
        x_ref[...], w_ref[...], preferred_element_type=jnp.float32)

    if use_acc_scratch:
        @pl.when(k == pl.num_programs(2) - 1)
        def _finalize():
            o_ref[...] = acc_ref[...].astype(o_ref.dtype)


# ---------------------------------------------------------------------------
# Generation-aware tile selection.
# ---------------------------------------------------------------------------
def _vmem_capacity_bytes():
    try:
        return int(pltpu.get_tpu_info().vmem_capacity_bytes)
    except Exception:
        return 64 * 1024 * 1024        # conservative (v7x-sized) fallback


def _pick_tiles(M, N, K, in_itemsize, out_itemsize, sub_min):
    vmem_cap = _vmem_capacity_bytes()
    # Working-set budget: ~55% of physical VMEM (leaves room for Mosaic
    # internals); caps comfortably under v7x's 64 MiB, uses much more on
    # v5e/v6e's 128 MiB than the old ~3 MiB tiles did.
    budget = min(int(vmem_cap * 0.55), 72 * 1024 * 1024)

    tm = min(512, _round_up(M, sub_min))
    tn = min(1024, _round_up(N, 128))   # multiples of 256 at default -> fills 2x256 MXU
    tk = min(1024, _round_up(K, 128))

    def usage(tm_, tn_, tk_):
        xb = 2 * tm_ * tk_ * in_itemsize           # double-buffered x tile
        wb = 2 * tk_ * tn_ * in_itemsize           # double-buffered W tile
        ob = 2 * tm_ * tn_ * out_itemsize          # double-buffered out tile
        ab = tm_ * tn_ * 4 if out_itemsize < 4 else 0   # f32 acc scratch
        bb = 2 * tn_ * 4                           # bias row (negligible)
        return xb + wb + ob + ab + bb

    # Shrink tiles (N first, then K, then M) until the working set fits.
    while usage(tm, tn, tk) > budget:
        if tn > 256:
            tn = _round_down_to(tn // 2, 128)
        elif tk > 256:
            tk = _round_down_to(tk // 2, 128)
        elif tm > sub_min:
            tm = _round_down_to(tm // 2, sub_min)
        else:
            break

    # Keep >= 2 output blocks so both TensorCores (v7x) get work; prefer
    # splitting N over M.  Free on single-TC v5e/v6e.
    def n_out_blocks(tm_, tn_):
        return _cdiv(_round_up(M, sub_min), tm_) * _cdiv(_round_up(N, 128), tn_)

    while n_out_blocks(tm, tn) < 2 and tn > 128:
        tn = _round_down_to(tn // 2, 128)
    while n_out_blocks(tm, tn) < 2 and tm > sub_min:
        tm = _round_down_to(tm // 2, sub_min)

    return tm, tn, tk, vmem_cap


# ---------------------------------------------------------------------------
# Wrapper: forward pass of the PyTorch MatMul module.
# ---------------------------------------------------------------------------
def matmul_module(x, matrix, bias=None, *, mxu_dtype="auto",
                  tm=None, tn=None, tk=None, w_buffer_count=None):
    """x (B,S,K) @ matrix (K,N) [+ bias (1,1,N)].

    mxu_dtype: "auto" (bf16 for large f32 problems, else keep input dtype),
               None (keep input dtype), or an explicit dtype such as
               jnp.bfloat16 / jnp.float8_e4m3fn (v7x).  Accumulation is
               always float32; output keeps x.dtype.
    tm/tn/tk:  optional explicit tile sizes; otherwise chosen from the
               device's VMEM capacity.
    w_buffer_count: optional deeper pipelining (pl.Buffered) on the W stream.
    """
    B, S, K = x.shape
    K2, N = matrix.shape
    assert K == K2, f"inner dims mismatch: {K} vs {K2}"
    M = B * S
    out_dtype = x.dtype
    x2d = x.reshape(M, K)

    # --- MXU feed dtype ----------------------------------------------------
    if mxu_dtype == "auto":
        if x2d.dtype == jnp.float32 and M >= 256 and N >= 256 and K >= 512:
            mxu_dtype = jnp.bfloat16   # native MXU rate, half the DMA bytes
        else:
            mxu_dtype = None           # small problem: keep fp32 numerics
    if mxu_dtype is not None:
        x2d = x2d.astype(mxu_dtype)
        matrix = matrix.astype(mxu_dtype)

    in_itemsize = jnp.dtype(x2d.dtype).itemsize
    out_itemsize = jnp.dtype(out_dtype).itemsize
    # Sublane pack: 8 rows for 4-byte dtypes, 16 for bf16, 32 for fp8/int8.
    sub_min = 8 * (4 // in_itemsize)

    # --- Tile sizes ----------------------------------------------------------
    auto_tm, auto_tn, auto_tk, vmem_cap = _pick_tiles(
        M, N, K, in_itemsize, out_itemsize, sub_min)
    tm = auto_tm if tm is None else min(_round_up(tm, sub_min), _round_up(M, sub_min))
    tn = auto_tn if tn is None else min(_round_up(tn, 128), _round_up(N, 128))
    tk = auto_tk if tk is None else min(_round_up(tk, 128), _round_up(K, 128))

    # --- Minimal padding -----------------------------------------------------
    Mp = _round_up(M, sub_min)     # rows: only to the sublane pack
    Np = _round_up(N, 128)         # cols: only to a full lane
    Kp = _round_up(K, tk)          # reduction: zero-pad to a full tile (exact sum)

    if (Mp, Kp) != (M, K):
        x2d = jnp.pad(x2d, ((0, Mp - M), (0, Kp - K)))
    # TODO(synk): in a real model, pre-pad/cast matrix & bias once outside the
    # hot path (they are constants) instead of per call.
    if (Kp, Np) != (K, N):
        matrix = jnp.pad(matrix, ((0, Kp - K), (0, Np - N)))

    has_bias = bias is not None
    inputs = [x2d, matrix]
    w_spec_kwargs = {}
    if w_buffer_count is not None and w_buffer_count > 2:
        w_spec_kwargs["pipeline_mode"] = pl.Buffered(w_buffer_count)
    in_specs = [
        pl.BlockSpec((tm, tk), lambda i, j, k: (i, k)),
        pl.BlockSpec((tk, tn), lambda i, j, k: (k, j), **w_spec_kwargs),
    ]
    if has_bias:
        b2d = bias.reshape(1, N)
        if Np != N:
            b2d = jnp.pad(b2d, ((0, 0), (0, Np - N)))
        in_specs.append(pl.BlockSpec((1, tn), lambda i, j, k: (0, j)))
        inputs.append(b2d)

    use_acc_scratch = jnp.dtype(out_dtype) != jnp.dtype(jnp.float32)
    scratch_shapes = ((pltpu.VMEM((tm, tn), jnp.float32),)
                      if use_acc_scratch else ())

    grid_m, grid_n, grid_k = _cdiv(Mp, tm), _cdiv(Np, tn), Kp // tk
    grid = (grid_m, grid_n, grid_k)

    # --- Cost estimate (x is re-read per N tile, W per M tile) ---------------
    bytes_accessed = (Mp * Kp * in_itemsize * grid_n
                      + Kp * Np * in_itemsize * grid_m
                      + Mp * Np * out_itemsize)
    if has_bias:
        bytes_accessed += Np * jnp.dtype(b2d.dtype).itemsize * grid_m
    cost = pl.CostEstimate(flops=2 * Mp * Kp * Np, transcendentals=0,
                           bytes_accessed=bytes_accessed)

    vmem_limit = max(32 * 1024 * 1024,
                     min(int(vmem_cap * 0.75), 112 * 1024 * 1024))

    kernel = functools.partial(_matmul_kernel, has_bias=has_bias,
                               use_acc_scratch=use_acc_scratch)

    out2d = pl.pallas_call(
        kernel,
        out_shape=jax.ShapeDtypeStruct((Mp, Np), out_dtype),
        grid=grid,
        in_specs=in_specs,
        out_specs=pl.BlockSpec((tm, tn), lambda i, j, k: (i, j)),
        scratch_shapes=scratch_shapes,
        compiler_params=pltpu.CompilerParams(
            dimension_semantics=("parallel", "parallel", "arbitrary"),
            vmem_limit_bytes=vmem_limit,
        ),
        cost_estimate=cost,
    )(*inputs)

    return out2d[:M, :N].reshape(B, S, N)


def xavier_normal(key, in_channels, out_channels, dtype=jnp.float32):
    # Matches torch.nn.init.xavier_normal_ (gain=1): std = sqrt(2/(fan_in+fan_out))
    std = (2.0 / (in_channels + out_channels)) ** 0.5
    return std * jax.random.normal(key, (in_channels, out_channels), dtype=dtype)


if __name__ == "__main__":
    key = jax.random.PRNGKey(0)
    k_x, k_w, k_b = jax.random.split(key, 3)

    batch, seq, in_channels, out_channels = 2, 8, 32, 64

    x = jax.random.normal(k_x, (batch, seq, in_channels), dtype=jnp.float32)
    matrix = xavier_normal(k_w, in_channels, out_channels)
    bias = 0.1 * jax.random.normal(k_b, (1, 1, out_channels), dtype=jnp.float32)

    # fp32 MXU path ("auto" keeps fp32 at these small shapes) -> tight check.
    out = jax.block_until_ready(matmul_module(x, matrix, bias))
    ref = jnp.matmul(x, matrix) + bias
    assert out.shape == (batch, seq, out_channels)
    assert jnp.allclose(out, ref, atol=1e-5, rtol=1e-5)

    # Bias-free path (handled statically, no zero bias row / extra DMA).
    out_nb = jax.block_until_ready(matmul_module(x, matrix, None))
    assert jnp.allclose(out_nb, jnp.matmul(x, matrix), atol=1e-5, rtol=1e-5)

    # Explicit bf16 MXU feed (what "auto" picks for large shapes); f32 accum,
    # so only the input rounding differs -> looser tolerance.
    out_bf16 = jax.block_until_ready(
        matmul_module(x, matrix, bias, mxu_dtype=jnp.bfloat16))
    assert jnp.allclose(out_bf16, ref, atol=5e-2, rtol=5e-2)

    print("KERNEL_OK")
</pallas_src>

<mosaic_0001>
module attributes {stable_mosaic.version = 11 : i64} {
  func.func @_matmul_kernel(%arg0: i32, %arg1: i32, %arg2: i32, %arg3: memref<8x128xf32, #tpu.memory_space<vmem>>, %arg4: memref<128x128xf32, #tpu.memory_space<vmem>>, %arg5: memref<1x128xf32, #tpu.memory_space<vmem>>, %arg6: memref<8x128xf32, #tpu.memory_space<vmem>>) attributes {dimension_semantics = [#tpu.dimension_semantics<parallel>, #tpu.dimension_semantics<parallel>, #tpu.dimension_semantics<arbitrary>], iteration_bounds = array<i64: 2, 1, 1>, scalar_prefetch = 0 : i64, scratch_operands = 0 : i64, tpu.core_type = #tpu.core_type<tc>, window_params = [{transform_indices = @transform_0, window_bounds = array<i64: 8, 128>}, {transform_indices = @transform_1, window_bounds = array<i64: 128, 128>}, {transform_indices = @transform_2, window_bounds = array<i64: 1, 128>}, {transform_indices = @transform_3, window_bounds = array<i64: 8, 128>}]} {
    %c0_i32 = arith.constant 0 : i32
    %0 = arith.cmpi eq, %arg2, %c0_i32 : i32
    %1 = arith.extui %0 : i1 to i32
    %c0_i32_0 = arith.constant 0 : i32
    %2 = arith.cmpi ne, %1, %c0_i32_0 : i32
    scf.if %2 {
      %c0_8 = arith.constant 0 : index
      %c0_9 = arith.constant 0 : index
      %9 = vector.load %arg5[%c0_8, %c0_9] : memref<1x128xf32, #tpu.memory_space<vmem>>, vector<1x128xf32>
      %10 = vector.shape_cast %9 : vector<1x128xf32> to vector<1x128xf32>
      %11 = vector.broadcast %10 : vector<1x128xf32> to vector<8x128xf32>
      %c0_10 = arith.constant 0 : index
      %c0_11 = arith.constant 0 : index
      %12 = vector.load %arg6[%c0_10, %c0_11] : memref<8x128xf32, #tpu.memory_space<vmem>>, vector<8x128xf32>
      tpu.vector_store %arg6[%c0_10, %c0_11], %11 {strides = array<i32>} : memref<8x128xf32, #tpu.memory_space<vmem>>, vector<8x128xf32>,
    } else {
    }
    %c0 = arith.constant 0 : index
    %c0_1 = arith.constant 0 : index
    %3 = vector.load %arg6[%c0, %c0_1] : memref<8x128xf32, #tpu.memory_space<vmem>>, vector<8x128xf32>
    %c0_2 = arith.constant 0 : index
    %c0_3 = arith.constant 0 : index
    %4 = vector.load %arg3[%c0_2, %c0_3] : memref<8x128xf32, #tpu.memory_space<vmem>>, vector<8x128xf32>
    %c0_4 = arith.constant 0 : index
    %c0_5 = arith.constant 0 : index
    %5 = vector.load %arg4[%c0_4, %c0_5] : memref<128x128xf32, #tpu.memory_space<vmem>>, vector<128x128xf32>
    %cst = arith.constant dense<0.000000e+00> : vector<8x128xf32>
    %6 = tpu.matmul %4, %5, %cst {dimension_numbers = #tpu.dot_dimension_numbers<[1], [0], [0], [1], [0, 0, 1, 1], [], []>} : vector<8x128xf32>, vector<128x128xf32>, vector<8x128xf32> -> vector<8x128xf32>
    %7 = arith.addf %3, %6 : vector<8x128xf32>
    %c0_6 = arith.constant 0 : index
    %c0_7 = arith.constant 0 : index
    %8 = vector.load %arg6[%c0_6, %c0_7] : memref<8x128xf32, #tpu.memory_space<vmem>>, vector<8x128xf32>
    tpu.vector_store %arg6[%c0_6, %c0_7], %7 {strides = array<i32>} : memref<8x128xf32, #tpu.memory_space<vmem>>, vector<8x128xf32>,
    return
  }
  func.func @transform_0(%arg0: i32, %arg1: i32, %arg2: i32) -> (i32, i32) {
    %c0_i32 = arith.constant 0 : i32
    return %arg0, %arg2 : i32, i32
  }
  func.func @transform_1(%arg0: i32, %arg1: i32, %arg2: i32) -> (i32, i32) {
    %c0_i32 = arith.constant 0 : i32
    return %arg2, %arg1 : i32, i32
  }
  func.func @transform_2(%arg0: i32, %arg1: i32, %arg2: i32) -> (i32, i32) {
    %c0_i32 = arith.constant 0 : i32
    %c0_i32_0 = arith.constant 0 : i32
    return %c0_i32, %arg1 : i32, i32
  }
  func.func @transform_3(%arg0: i32, %arg1: i32, %arg2: i32) -> (i32, i32) {
    %c0_i32 = arith.constant 0 : i32
    return %arg0, %arg1 : i32, i32
  }
}

</mosaic_0001>

<bundles_post_ra>
// kernel: tpu_custom_call.1
= control target key start
LH: loop header
LB: loop body
LE: loop exit
PB: predicated region body
PF: predicated region fallthrough
CT: control target
= control target key end

     0   :  { %8 = vsyncpa [#allocation3], 0  ;;  %s973_s0 = inlined_call_operand.hbm [shape: f32[16,128], index: 0, kind: input, shape index: {}]   ;;  %s974_s1 = inlined_call_operand.hbm [shape: f32[128,128], index: 1, kind: input, shape index: {}]   ;;  %s975_s2 = inlined_call_operand.vmem [shape: f32[1,128], index: 2, kind: input, shape index: {}]   ;;  %s976_s3 = inlined_call_operand.hbm [shape: f32[16,128], index: 3, kind: output, shape index: {}]  }
   0x1   :  { %10 = vsyncpa [#allocation3 + $0x1], 0 }
   0x2   :  { %11 = vsyncpa [#allocation6], 0 }
   0x3   :  { %12 = vsyncpa [#allocation4], 0 }
   0x4   :  { %14 = vsyncpa [#allocation4 + $0x1], 0  ;;  %s790_s12 = smov 0   ;;  %s792_s13 = smov 0  }
   0x5   :  { %s794_s14 = smov 0   ;;  %s796_s15 = smov 0  }
   0x6   :  { %s798_s16 = smov 0   ;;  %s800_s17 = smov 0  }
   0x7 LB: > { %s477_s18 = sadd.s32 4294967295, %s761_s17   ;;  %s478_s19 = sadd.s32 4294967294, %s761_s17   ;;  %s761_s17 = sphi %s800_s17, %s20_s17   ;;  %s757_s16 = sphi %s798_s16, %s994_s16   ;;  %s753_s15 = sphi %s796_s15, %s993_s15   ;;  %s749_s14 = sphi %s794_s14, %s992_s14   ;;  %s745_s13 = sphi %s792_s13, %s991_s13   ;;  %s741_s12 = sphi %s790_s12, %s990_s12  }
   0x8   : > { %p61_p0 = scmp.ne.s32.totalorder %s745_s13, %s741_s12  ;;  %p824_p1 = scmp.eq.s32.totalorder %s477_s18, 0 }
   0x9   : > { %p828_p2 = scmp.eq.s32.totalorder %s477_s18, 1  ;;  %p147_p3 = scmp.eq.s32.totalorder %s478_s19, 1 }
   0xa   : > { %p834_p4 = por %p824_p1, %p61_p0  ;;  %p479_p5 = scmp.ge.s32.totalorder %s761_s17, 1 }
   0xb   : > { %p839_p6 = por %p147_p3, %p61_p0  ;;  %p154_p7 = scmp.lt.s32.totalorder %s761_s17, 3 }
   0xc   : > { %s980_s22 = scalar_select %p834_p4, 1, 0 }
   0xd   : > { %s981_s23 = scalar_select %p839_p6, 1, 0 }
   0xe   : > { %p844_p8 = pnand %p479_p5, %p154_p7  ;;  %s763_s25 = smov [#allocation5]  }
   0xf   : > { %s170_s26 = sshll.u32 %s763_s25, 4  ;;  %s39_s28 = sadd.s32 1, %s757_s16  ;;  %s171_s26 = int_to_ptr.vmem [resolvable:$true] %s170_s26 }
  0x10   : > { %p554_p9 = pneg %p844_p8  ;;  %s634_s29 = scalar_lea.vmem %s171_s26, 2048 }
  0x11   : > { %p635_p13 = scmp.ne.s32.totalorder %s171_s26, %s634_s29  ;;  %p642_p5 = scmp.lt.s32.totalorder %s171_s26, %s171_s26 }
  0x12   : > { %p853_p11 = pnand %p554_p9, %p824_p1  ;;  %p643_p7 = scmp.lt.s32.totalorder %s634_s29, %s634_s29 }
  0x14   : > { %p625_p12 = pneg %p853_p11  ;;  %p644_p6 = por %p643_p7, %p642_p5 }
  0x16   : > { %p637_p0 = pnand %p635_p13, %p625_p12 }
  0x18   : > { %p638_p3 = pneg %p637_p0 }
  0x1a   : > { %p645_p4 = pnand %p644_p6, %p638_p3 }
  0x1c   : > { %648 = shalt.err (!%p645_p4)
}
  0x1d   : > { %s764_s30 = smov 128   ;;  %s765_s4 = smov 8  }
  0x1e   : > { %557 = dma.hbm_to_vmem [thread:$0]  (!%p853_p11), %s974_s1, 2048, %s171_s26, [#allocation6], %s764_s30, %s764_s30, %s765_s4  }
  0x1f   : > { %p41_p6 = scmp.ge.s32.totalorder %s39_s28, 2  ;;  %s48_s7 = sadd.s32 1, %s749_s14 }
  0x20   : > { %p55_p4 = scmp.ne.s32.totalorder %s749_s14, %s745_s13  ;;  %p56_p9 = scmp.eq.s32.totalorder %s761_s17, 0 }
  0x21   : > { %s996_s28 = smov (%p41_p6, %s39_s28), 0  ;;  %p567_p0 = scmp.lt.s32.totalorder %s761_s17, 2 }
  0x22   : > { %p871_p12 = por %p56_p9, %p55_p4  ;;  %p877_p13 = por %p828_p2, %p55_p4 }
  0x23   : > { %s43_s10 = ssub.s32 %s757_s16, %s996_s28  ;;  %s190_s11 = sand.u32 1, %s749_s14  }
  0x24   : > { %p46_p11 = scmp.eq.s32.totalorder %s43_s10, 0  ;;  %s483_s18 = sshll.u32 %s190_s11, 3 }
  0x25   : > { %s484_s25 = sshll.u32 %s757_s16, 7  ;;  %s194_s30 = scalar_lea.vmem [#allocation2], %s483_s18 }
  0x26   : > { %s886_s19 = scalar_select %p46_p11, %s749_s14, %s48_s7  }
  0x27   : > { %s200_s29 = scalar_lea.hbm %s973_s0, %s484_s25  ;;  %s202_s4 = sshll.u32 %s194_s30, 4  ;;  %s203_s4 = int_to_ptr.vmem [resolvable:$true] %s202_s4 }
  0x28   : > { %p894_p2 = pnand %p567_p0, %p871_p12  ;;  %s191_s5 = scalar_lea.sflag [#allocation3], %s190_s11 }
  0x29   : > { %s662_s6 = scalar_lea.vmem %s203_s4, 128  ;;  %s766_s7 = smov [#allocation2]  }
  0x2a   : > { %p651_p3 = pneg %p894_p2  ;;  %p663_p5 = scmp.ne.s32.totalorder %s203_s4, %s662_s6 }
  0x2b   : > { %s667_s10 = sshll.u32 %s766_s7, 4  ;;  %s668_s10 = int_to_ptr.vmem [resolvable:$false] %s667_s10 }
  0x2c   : > { %p665_p7 = pnand %p663_p5, %p651_p3  ;;  %s669_s25 = scalar_lea.vmem %s668_s10, 256 }
  0x2d   : > { %p670_p4 = scmp.lt.s32.totalorder %s203_s4, %s668_s10  ;;  %p671_p9 = scmp.lt.s32.totalorder %s669_s25, %s662_s6 }
  0x2e   : > { %p666_p6 = pneg %p665_p7 }
  0x2f   : > { %p672_p11 = por %p671_p9, %p670_p4 }
  0x31   : > { %p673_p10 = pnand %p672_p11, %p666_p6 }
  0x33   : > { %676 = shalt.err (!%p673_p10)
}
  0x34   : > { %561 = dma.hbm_to_vmem [thread:$0]  (!%p894_p2), %s200_s29, 128, %s203_s4, %s191_s5  }
  0x35   : > { %211 = sbr.rel (%p844_p8) target bundleno = 302 (0x12e), region = 32  ;;  %s905_s8 = sand.u32 (!%p844_p8), 1, %s745_s13  }
  0x36   : > { %s486_s11 = sshll.u32 (!%p844_p8), %s905_s8, 3  ;;  %s214_s18 = scalar_lea.sflag (!%p844_p8), [#allocation3], %s905_s8 }
  0x37   : > { %s911_s26 = scalar_lea.vmem (!%p844_p8), [#allocation2], %s486_s11  ;;  %p987_p12 = scmp.ne.s32.totalorder (!%p844_p8), %s980_s22, 0 }
  0x3a   : > { %728 = dma.done.wait (%p987_p12), %s214_s18, 128  }
  0x3b   : > { %730 = vsyncadd (%p987_p12), %s214_s18, 4294967168 }
  0x3c   : > { %732 = dma.done.wait (%p824_p1), [#allocation6], 2048  }
  0x3d   : > { %734 = vsyncadd (%p824_p1), [#allocation6], 4294965248  ;;  %v767_v0 = vmov 0.0   ;;  %vm768_vm0 = vmmov 0   ;;  %v280_v1 = vld [vmem:[#allocation5 + $0x78] sm:$0xff]  ;;  %v279_v2 = vld [vmem:[#allocation5 + $0x70] sm:$0xff] }
  0x3e   : > { %511 = vmatprep.subr.mxu0 %v767_v0  ;;  %543 = vmatprep.mubr.msk.f32.mxu0 %vm768_vm0, %v767_v0  ;;  %v278_v3 = vld [vmem:[#allocation5 + $0x68] sm:$0xff]  ;;  %v277_v4 = vld [vmem:[#allocation5 + $0x60] sm:$0xff]  ;;  %v276_v5 = vld [vmem:[#allocation5 + $0x58] sm:$0xff]  ;;  %s491_s24 = sshll.u32 %s753_s15, 7  ;;  %s246_s27 = scalar_lea.vmem [#allocation7], %s486_s11 }
  0x3f   : > { %512 = vmatpush3.msra.mxu0 %v280_v1  ;;  %v275_v6 = vld [vmem:[#allocation5 + $0x50] sm:$0xff]  ;;  %v274_v7 = vld [vmem:[#allocation5 + $0x48] sm:$0xff]  ;;  %v273_v8 = vld [vmem:[#allocation5 + $0x40] sm:$0xff]  ;;  %s368_s29 = sshll.u32 %s246_s27, 4  ;;  %s931_s21 = scalar_lea.hbm %s976_s3, %s491_s24  ;;  %s369_s29 = int_to_ptr.vmem [resolvable:$true] %s368_s29 }
  0x40   : > { %513 = vmatprep.subr.mxu0 %v767_v0  ;;  %v272_v9 = vld [vmem:[#allocation5 + $0x38] sm:$0xff]  ;;  %v271_v10 = vld [vmem:[#allocation5 + $0x30] sm:$0xff]  ;;  %v270_v11 = vld [vmem:[#allocation5 + $0x28] sm:$0xff]  ;;  %s354_s5 = scalar_lea.sflag [#allocation4], %s905_s8  ;;  %s677_s6 = scalar_lea.vmem %s369_s29, 128 }
  0x41   : > { %514 = vmatpush3.msra.mxu0 %v279_v2  ;;  %v269_v12 = vld [vmem:[#allocation5 + $0x20] sm:$0xff]  ;;  %v268_v13 = vld [vmem:[#allocation5 + $0x18] sm:$0xff]  ;;  %v267_v14 = vld [vmem:[#allocation5 + $0x10] sm:$0xff]  ;;  %p678_p1 = scmp.ne.s32.totalorder %s369_s29, %s677_s6  ;;  %s769_s15 = smov [#allocation7]  }
  0x42   : > { %515 = vmatprep.subr.mxu0 %v767_v0  ;;  %v266_v15 = vld [vmem:[#allocation5 + $0x8] sm:$0xff]  ;;  %v265_v16 = vld [vmem:[#allocation5] sm:$0xff]  ;;  %v264_v17 = vld [vmem:[%s911_s26] sm:$0xff]  ;;  %s681_s7 = sshll.u32 %s769_s15, 4  ;;  %s682_s7 = int_to_ptr.vmem [resolvable:$false] %s681_s7 }
  0x43   : > { %516 = vmatpush3.msra.mxu0 %v278_v3  ;;  %v489_v18 = vld [vmem:[%s975_s2] ss:$0 sm:$0xff]  ;;  %p679_p8 = pnand %p678_p1, %p877_p13  ;;  %s683_s10 = scalar_lea.vmem %s682_s7, 256 }
  0x44   : > { %517 = vmatprep.subr.mxu0 %v767_v0  ;;  %p684_p0 = scmp.lt.s32.totalorder %s369_s29, %s682_s7  ;;  %p685_p2 = scmp.lt.s32.totalorder %s683_s10, %s677_s6 }
  0x45   : > { %518 = vmatpush3.msra.mxu0 %v277_v4  ;;  %p680_p10 = pneg %p679_p8 }
  0x46   : > { %519 = vmatprep.subr.mxu0 %v767_v0  ;;  %p686_p3 = por %p685_p2, %p684_p0 }
  0x47   : > { %520 = vmatpush3.msra.mxu0 %v276_v5 }
  0x48   : > { %521 = vmatprep.subr.mxu0 %v767_v0  ;;  %p687_p5 = pnand %p686_p3, %p680_p10 }
  0x49   : > { %522 = vmatpush3.msra.mxu0 %v275_v6 }
  0x4a   : > { %523 = vmatprep.subr.mxu0 %v767_v0 }
  0x4b   : > { %524 = vmatpush3.msra.mxu0 %v274_v7 }
  0x4c   : > { %525 = vmatprep.subr.mxu0 %v767_v0 }
  0x4d   : > { %526 = vmatpush3.msra.mxu0 %v273_v8 }
  0x4e   : > { %527 = vmatprep.subr.mxu0 %v767_v0 }
  0x4f   : > { %528 = vmatpush3.msra.mxu0 %v272_v9 }
  0x50   : > { %529 = vmatprep.subr.mxu0 %v767_v0 }
  0x51   : > { %530 = vmatpush3.msra.mxu0 %v271_v10 }
  0x52   : > { %531 = vmatprep.subr.mxu0 %v767_v0 }
  0x53   : > { %532 = vmatpush3.msra.mxu0 %v270_v11 }
  0x54   : > { %533 = vmatprep.subr.mxu0 %v767_v0 }
  0x55   : > { %534 = vmatpush3.msra.mxu0 %v269_v12 }
  0x56   : > { %535 = vmatprep.subr.mxu0 %v767_v0 }
  0x57   : > { %536 = vmatpush3.msra.mxu0 %v268_v13 }
  0x58   : > { %537 = vmatprep.subr.mxu0 %v767_v0 }
  0x59   : > { %538 = vmatpush3.msra.mxu0 %v267_v14 }
  0x5a   : > { %539 = vmatprep.subr.mxu0 %v767_v0 }
  0x5b   : > { %540 = vmatpush3.msra.mxu0 %v266_v15 }
  0x5c   : > { %541 = vmatprep.subr.mxu0 %v767_v0 }
  0x5d   : > { %542 = vmatpush3.msra.mxu0 %v265_v16 }
  0x5e   : > { %544 = vmatmul.mubr.f32.vlgmr.msra.gmra.mxu0 %v264_v17 }
 0x11e   : > { %v347_v19 = vpop.f32.mrf.mxu0 }
 0x11f   : > { %v351_v20 = vadd.f32 %v489_v18, %v347_v19 }
 0x120   : > { %v545_v21 = vpop.f32.mrf.mxu0 }
 0x121   : > { %352 = vst [vmem:[%s246_s27] sm:$0xff] %v351_v20 }
 0x122   : > { %690 = shalt.err (!%p687_p5)
}
 0x123   : > { %s691_s25 = scalar_lea.hbm %s931_s21, 128  ;;  %s695_s18 = scalar_lea.hbm %s976_s3, 256 }
 0x124   : > { %p692_p7 = scmp.ne.s32.totalorder %s931_s21, %s691_s25  ;;  %p696_p9 = scmp.lt.s32.totalorder %s931_s21, %s976_s3 }
 0x125   : > { %p697_p11 = scmp.lt.s32.totalorder %s695_s18, %s691_s25 }
 0x126   : > { %p693_p6 = pnand %p692_p7, %p877_p13 }
 0x127   : > { %p698_p12 = por %p697_p11, %p696_p9 }
 0x128   : > { %p694_p4 = pneg %p693_p6 }
 0x12a   : > { %p699_p1 = pnand %p698_p12, %p694_p4 }
 0x12c   : > { %702 = shalt.err (!%p699_p1)
}
 0x12d   : > { %552 = dma.vmem_to_hbm [thread:$0]  (%p877_p13), %s369_s29, 128, %s931_s21, %s354_s5  }
 0x12e PF: > { %s380_s22 = sand.u32 1, %s741_s12   ;;  %p988_p8 = scmp.ne.s32.totalorder %s981_s23, 0 }
 0x12f   : > { %p989_p10 = scmp.ge.s32.totalorder %s761_s17, 2  ;;  %s381_s24 = scalar_lea.sflag [#allocation4], %s380_s22 }
 0x131   : > { %p563_p0 = pnand %p989_p10, %p988_p8 }
 0x133   : > { %p564_p2 = pneg %p563_p0 }
 0x135   : > { %736 = dma.done.wait (%p564_p2), %s381_s24, 128  }
 0x136   : > { %738 = vsyncadd (%p564_p2), %s381_s24, 4294967168  ;;  %s20_s17 = sadd.s32 1, %s761_s17   ;;  %s990_s12 = smov %s745_s13 }
 0x137   : > { %p17_p3 = scmp.ge.s32.totalorder %s20_s17, 4   ;;  %s991_s13 = smov %s749_s14 }
 0x138   : > { %s992_s14 = smov %s886_s19  ;;  %s993_s15 = smov %s757_s16 }
 0x139   : > { %s994_s16 = smov %s996_s28  ;;  %19 = sbr.rel (!%p17_p3) target bundleno = 7 (0x7), region = 89 }
 0x13e   :  { %386 = vsyncpa [#allocation3], 1 }
 0x13f   :  { %388 = vsyncpa [#allocation3 + $0x1], 1 }
 0x140   :  { %389 = vsyncpa [#allocation6], 1 }
 0x141   :  { %390 = vsyncpa [#allocation4], 1 }
 0x142   :  { %392 = vsyncpa [#allocation4 + $0x1], 1 }

</bundles_post_ra>
